<compile_context>
chip_gen: v5e
topology: v5e:2x2
jax: 0.10.0
libtpu: 0.0.40
codegen_flags: <defaults>
</compile_context>

<pallas_src>
import math

import jax
import jax.numpy as jnp
from jax.experimental import pallas as pl
from jax.experimental.pallas import tpu as pltpu


def _round_up(v, m):
    return ((v + m - 1) // m) * m


# --------------------------------------------------------------------------- #
# Kernel
# --------------------------------------------------------------------------- #
def _three_head_dqn_kernel(x_ref,
                           w0_ref, b0_ref,
                           w1_ref, b1_ref,
                           w2_ref, b2_ref,
                           wh_ref, bh_ref,
                           out_ref):
    """Fused trunk (3x Linear+ReLU) + fused 3-head Linear for one batch tile.

    Matmuls hit the MXU with (bf16 x bf16 -> f32) when weights are bf16;
    bias adds and ReLUs stay in f32 on the VPU.
    """
    h = jnp.dot(x_ref[...].astype(w0_ref.dtype), w0_ref[...],
                preferred_element_type=jnp.float32) + b0_ref[...]
    h = jnp.maximum(h, 0.0)

    h = jnp.dot(h.astype(w1_ref.dtype), w1_ref[...],
                preferred_element_type=jnp.float32) + b1_ref[...]
    h = jnp.maximum(h, 0.0)

    h = jnp.dot(h.astype(w2_ref.dtype), w2_ref[...],
                preferred_element_type=jnp.float32) + b2_ref[...]
    h = jnp.maximum(h, 0.0)

    # All three Q heads fused into one lane-dense matmul + one dense store.
    out_ref[...] = jnp.dot(h.astype(wh_ref.dtype), wh_ref[...],
                           preferred_element_type=jnp.float32) + bh_ref[...]


# --------------------------------------------------------------------------- #
# Wrapper
# --------------------------------------------------------------------------- #
def three_head_dqn_forward(x, kp, *, block_batch=256):
    """x: (batch, history*7-3) float32. kp: output of prepare_params()."""
    batch, in_features = x.shape
    in_pad = kp["w0"].shape[0]
    head_pad = kp["wh"].shape[1]
    n1, n2, n3 = kp["n_actions"]

    x = x.astype(jnp.float32)
    if in_features != in_pad:  # zero-pad features to the aligned width
        x = jnp.pad(x, ((0, 0), (0, in_pad - in_features)))

    # Batch tiling: small batches -> one 8-row tile; large batches -> 256-row
    # tiles pipelined and megacore-sharded across the grid.
    tb = max(8, min(block_batch, _round_up(batch, 8)))
    padded_batch = _round_up(batch, tb)
    if padded_batch != batch:
        x = jnp.pad(x, ((0, padded_batch - batch), (0, 0)))
    grid = (padded_batch // tb,)

    operands = (x,
                kp["w0"], kp["b0"],
                kp["w1"], kp["b1"],
                kp["w2"], kp["b2"],
                kp["wh"], kp["bh"])

    def _const_map(i):
        return (0, 0)

    in_specs = [pl.BlockSpec((tb, in_pad), lambda i: (i, 0))]
    in_specs += [pl.BlockSpec(op.shape, _const_map) for op in operands[1:]]
    out_specs = pl.BlockSpec((tb, head_pad), lambda i: (i, 0))

    flops = 2 * padded_batch * (in_pad * 512 + 512 * 256 + 256 * 128
                                + 128 * head_pad)
    bytes_accessed = sum(int(op.size) * op.dtype.itemsize for op in operands)
    bytes_accessed += padded_batch * head_pad * 4

    out = pl.pallas_call(
        _three_head_dqn_kernel,
        out_shape=jax.ShapeDtypeStruct((padded_batch, head_pad), jnp.float32),
        grid=grid,
        in_specs=in_specs,
        out_specs=out_specs,
        compiler_params=pltpu.CompilerParams(
            dimension_semantics=("parallel",)),
        cost_estimate=pl.CostEstimate(
            flops=int(flops), transcendentals=0,
            bytes_accessed=int(bytes_accessed)),
    )(*operands)

    q1 = out[:batch, :n1]
    q2 = out[:batch, n1:n1 + n2]
    q3 = out[:batch, n1 + n2:n1 + n2 + n3]
    return q1, q2, q3


# --------------------------------------------------------------------------- #
# Parameter construction (mirrors the PyTorch module's init_weights)
# --------------------------------------------------------------------------- #
def _kaiming_uniform(key, fan_in, fan_out):
    """torch.nn.init.kaiming_uniform_(mode='fan_in', nonlinearity='relu').

    gain = sqrt(2); bound = gain * sqrt(3 / fan_in) = sqrt(6 / fan_in).
    Returned in (in, out) layout (transpose of torch's (out, in)).
    """
    bound = math.sqrt(6.0 / fan_in)
    w = jax.random.uniform(key, (fan_out, fan_in), jnp.float32, -bound, bound)
    return jnp.transpose(w)


def init_params(key, history, n_action1, n_action2, n_action3):
    in_features = history * 7 - 3
    dims = [
        ("w0", "b0", in_features, 512),
        ("w1", "b1", 512, 256),
        ("w2", "b2", 256, 128),
        ("wh1", "bh1", 128, n_action1),
        ("wh2", "bh2", 128, n_action2),
        ("wh3", "bh3", 128, n_action3),
    ]
    params = {}
    keys = jax.random.split(key, len(dims))
    for k, (wname, bname, fin, fout) in zip(keys, dims):
        params[wname] = _kaiming_uniform(k, fin, fout)
        params[bname] = jnp.zeros((1, fout), jnp.float32)  # init.zeros_
    return params


def prepare_params(params, n_action1, n_action2, n_action3,
                   weight_dtype=jnp.bfloat16):
    """Pad / fuse / cast parameters into the layout the kernel expects."""
    in_features = params["w0"].shape[0]
    in_pad = _round_up(in_features, 64)
    w0 = jnp.pad(params["w0"], ((0, in_pad - in_features), (0, 0)))

    n_total = n_action1 + n_action2 + n_action3
    head_pad = _round_up(n_total, 128)
    wh = jnp.concatenate(
        [params["wh1"], params["wh2"], params["wh3"]], axis=1)
    wh = jnp.pad(wh, ((0, 0), (0, head_pad - n_total)))
    bh = jnp.concatenate(
        [params["bh1"], params["bh2"], params["bh3"]], axis=1)
    bh = jnp.pad(bh, ((0, 0), (0, head_pad - n_total)))

    return {
        "w0": w0.astype(weight_dtype),
        "b0": params["b0"].astype(jnp.float32),
        "w1": params["w1"].astype(weight_dtype),
        "b1": params["b1"].astype(jnp.float32),
        "w2": params["w2"].astype(weight_dtype),
        "b2": params["b2"].astype(jnp.float32),
        "wh": wh.astype(weight_dtype),
        "bh": bh.astype(jnp.float32),
        "n_actions": (n_action1, n_action2, n_action3),
    }


# --------------------------------------------------------------------------- #
# Plain-JAX reference (same math / dtypes as the kernel) for sanity checking
# --------------------------------------------------------------------------- #
def reference_forward(x, kp):
    wdt = kp["w0"].dtype
    in_pad = kp["w0"].shape[0]
    xp = jnp.pad(x.astype(jnp.float32),
                 ((0, 0), (0, in_pad - x.shape[1]))).astype(wdt)
    h = jnp.maximum(jnp.dot(xp, kp["w0"],
                            preferred_element_type=jnp.float32) + kp["b0"], 0.0)
    h = jnp.maximum(jnp.dot(h.astype(wdt), kp["w1"],
                            preferred_element_type=jnp.float32) + kp["b1"], 0.0)
    h = jnp.maximum(jnp.dot(h.astype(wdt), kp["w2"],
                            preferred_element_type=jnp.float32) + kp["b2"], 0.0)
    q = jnp.dot(h.astype(wdt), kp["wh"],
                preferred_element_type=jnp.float32) + kp["bh"]
    n1, n2, n3 = kp["n_actions"]
    return q[:, :n1], q[:, n1:n1 + n2], q[:, n1 + n2:n1 + n2 + n3]


if __name__ == "__main__":
    history = 8                      # -> in_features = 8*7 - 3 = 53
    n_action1, n_action2, n_action3 = 4, 3, 5
    batch = 2

    key = jax.random.PRNGKey(0)
    k_params, k_x = jax.random.split(key)

    raw_params = init_params(k_params, history, n_action1, n_action2, n_action3)
    kernel_params = prepare_params(raw_params, n_action1, n_action2, n_action3,
                                   weight_dtype=jnp.bfloat16)
    x = jax.random.normal(k_x, (batch, history * 7 - 3), dtype=jnp.float32)

    q1, q2, q3 = three_head_dqn_forward(x, kernel_params)
    jax.block_until_ready((q1, q2, q3))

    # Cross-check against a plain-JAX reference using the same dtypes.
    r1, r2, r3 = reference_forward(x, kernel_params)
    assert q1.shape == (batch, n_action1)
    assert q2.shape == (batch, n_action2)
    assert q3.shape == (batch, n_action3)
    assert jnp.allclose(q1, r1, atol=1e-3, rtol=1e-3)
    assert jnp.allclose(q2, r2, atol=1e-3, rtol=1e-3)
    assert jnp.allclose(q3, r3, atol=1e-3, rtol=1e-3)

    print("KERNEL_OK")
</pallas_src>

<mosaic_0001>
module attributes {stable_mosaic.version = 11 : i64} {
  func.func @_three_head_dqn_kernel(%arg0: i32, %arg1: memref<8x64xf32, #tpu.memory_space<vmem>>, %arg2: memref<64x512xbf16, #tpu.memory_space<vmem>>, %arg3: memref<1x512xf32, #tpu.memory_space<vmem>>, %arg4: memref<512x256xbf16, #tpu.memory_space<vmem>>, %arg5: memref<1x256xf32, #tpu.memory_space<vmem>>, %arg6: memref<256x128xbf16, #tpu.memory_space<vmem>>, %arg7: memref<1x128xf32, #tpu.memory_space<vmem>>, %arg8: memref<128x128xbf16, #tpu.memory_space<vmem>>, %arg9: memref<1x128xf32, #tpu.memory_space<vmem>>, %arg10: memref<8x128xf32, #tpu.memory_space<vmem>>) attributes {dimension_semantics = [#tpu.dimension_semantics<parallel>], iteration_bounds = array<i64: 1>, scalar_prefetch = 0 : i64, scratch_operands = 0 : i64, tpu.core_type = #tpu.core_type<tc>, window_params = [{transform_indices = @transform_0, window_bounds = array<i64: 8, 64>}, {pipeline_mode = #tpu.pipeline_mode<synchronous>, transform_indices = @transform_1, window_bounds = array<i64: 64, 512>}, {pipeline_mode = #tpu.pipeline_mode<synchronous>, transform_indices = @transform_2, window_bounds = array<i64: 1, 512>}, {pipeline_mode = #tpu.pipeline_mode<synchronous>, transform_indices = @transform_3, window_bounds = array<i64: 512, 256>}, {pipeline_mode = #tpu.pipeline_mode<synchronous>, transform_indices = @transform_4, window_bounds = array<i64: 1, 256>}, {pipeline_mode = #tpu.pipeline_mode<synchronous>, transform_indices = @transform_5, window_bounds = array<i64: 256, 128>}, {pipeline_mode = #tpu.pipeline_mode<synchronous>, transform_indices = @transform_6, window_bounds = array<i64: 1, 128>}, {pipeline_mode = #tpu.pipeline_mode<synchronous>, transform_indices = @transform_7, window_bounds = array<i64: 128, 128>}, {pipeline_mode = #tpu.pipeline_mode<synchronous>, transform_indices = @transform_8, window_bounds = array<i64: 1, 128>}, {transform_indices = @transform_9, window_bounds = array<i64: 8, 128>}]} {
    %c0 = arith.constant 0 : index
    %c0_0 = arith.constant 0 : index
    %0 = vector.load %arg1[%c0, %c0_0] : memref<8x64xf32, #tpu.memory_space<vmem>>, vector<8x64xf32>
    %1 = arith.truncf %0 : vector<8x64xf32> to vector<8x64xbf16>
    %c0_1 = arith.constant 0 : index
    %c0_2 = arith.constant 0 : index
    %2 = vector.load %arg2[%c0_1, %c0_2] : memref<64x512xbf16, #tpu.memory_space<vmem>>, vector<64x512xbf16>
    %cst = arith.constant dense<0.000000e+00> : vector<8x512xf32>
    %3 = tpu.matmul %1, %2, %cst {dimension_numbers = #tpu.dot_dimension_numbers<[1], [0], [0], [1], [0, 0, 1, 1], [], []>} : vector<8x64xbf16>, vector<64x512xbf16>, vector<8x512xf32> -> vector<8x512xf32>
    %c0_3 = arith.constant 0 : index
    %c0_4 = arith.constant 0 : index
    %4 = vector.load %arg3[%c0_3, %c0_4] : memref<1x512xf32, #tpu.memory_space<vmem>>, vector<1x512xf32>
    %5 = vector.broadcast %4 : vector<1x512xf32> to vector<8x512xf32>
    %6 = arith.addf %3, %5 : vector<8x512xf32>
    %cst_5 = arith.constant 0.000000e+00 : f32
    %7 = vector.broadcast %cst_5 : f32 to vector<8x512xf32>
    %8 = arith.maximumf %6, %7 : vector<8x512xf32>
    %9 = arith.truncf %8 : vector<8x512xf32> to vector<8x512xbf16>
    %c0_6 = arith.constant 0 : index
    %c0_7 = arith.constant 0 : index
    %10 = vector.load %arg4[%c0_6, %c0_7] : memref<512x256xbf16, #tpu.memory_space<vmem>>, vector<512x256xbf16>
    %cst_8 = arith.constant dense<0.000000e+00> : vector<8x256xf32>
    %11 = tpu.matmul %9, %10, %cst_8 {dimension_numbers = #tpu.dot_dimension_numbers<[1], [0], [0], [1], [0, 0, 1, 1], [], []>} : vector<8x512xbf16>, vector<512x256xbf16>, vector<8x256xf32> -> vector<8x256xf32>
    %c0_9 = arith.constant 0 : index
    %c0_10 = arith.constant 0 : index
    %12 = vector.load %arg5[%c0_9, %c0_10] : memref<1x256xf32, #tpu.memory_space<vmem>>, vector<1x256xf32>
    %13 = vector.broadcast %12 : vector<1x256xf32> to vector<8x256xf32>
    %14 = arith.addf %11, %13 : vector<8x256xf32>
    %cst_11 = arith.constant 0.000000e+00 : f32
    %15 = vector.broadcast %cst_11 : f32 to vector<8x256xf32>
    %16 = arith.maximumf %14, %15 : vector<8x256xf32>
    %17 = arith.truncf %16 : vector<8x256xf32> to vector<8x256xbf16>
    %c0_12 = arith.constant 0 : index
    %c0_13 = arith.constant 0 : index
    %18 = vector.load %arg6[%c0_12, %c0_13] : memref<256x128xbf16, #tpu.memory_space<vmem>>, vector<256x128xbf16>
    %cst_14 = arith.constant dense<0.000000e+00> : vector<8x128xf32>
    %19 = tpu.matmul %17, %18, %cst_14 {dimension_numbers = #tpu.dot_dimension_numbers<[1], [0], [0], [1], [0, 0, 1, 1], [], []>} : vector<8x256xbf16>, vector<256x128xbf16>, vector<8x128xf32> -> vector<8x128xf32>
    %c0_15 = arith.constant 0 : index
    %c0_16 = arith.constant 0 : index
    %20 = vector.load %arg7[%c0_15, %c0_16] : memref<1x128xf32, #tpu.memory_space<vmem>>, vector<1x128xf32>
    %21 = vector.broadcast %20 : vector<1x128xf32> to vector<8x128xf32>
    %22 = arith.addf %19, %21 : vector<8x128xf32>
    %cst_17 = arith.constant 0.000000e+00 : f32
    %23 = vector.broadcast %cst_17 : f32 to vector<8x128xf32>
    %24 = arith.maximumf %22, %23 : vector<8x128xf32>
    %25 = arith.truncf %24 : vector<8x128xf32> to vector<8x128xbf16>
    %c0_18 = arith.constant 0 : index
    %c0_19 = arith.constant 0 : index
    %26 = vector.load %arg8[%c0_18, %c0_19] : memref<128x128xbf16, #tpu.memory_space<vmem>>, vector<128x128xbf16>
    %cst_20 = arith.constant dense<0.000000e+00> : vector<8x128xf32>
    %27 = tpu.matmul %25, %26, %cst_20 {dimension_numbers = #tpu.dot_dimension_numbers<[1], [0], [0], [1], [0, 0, 1, 1], [], []>} : vector<8x128xbf16>, vector<128x128xbf16>, vector<8x128xf32> -> vector<8x128xf32>
    %c0_21 = arith.constant 0 : index
    %c0_22 = arith.constant 0 : index
    %28 = vector.load %arg9[%c0_21, %c0_22] : memref<1x128xf32, #tpu.memory_space<vmem>>, vector<1x128xf32>
    %29 = vector.broadcast %28 : vector<1x128xf32> to vector<8x128xf32>
    %30 = arith.addf %27, %29 : vector<8x128xf32>
    %c0_23 = arith.constant 0 : index
    %c0_24 = arith.constant 0 : index
    %31 = vector.load %arg10[%c0_23, %c0_24] : memref<8x128xf32, #tpu.memory_space<vmem>>, vector<8x128xf32>
    tpu.vector_store %arg10[%c0_23, %c0_24], %30 {strides = array<i32>} : memref<8x128xf32, #tpu.memory_space<vmem>>, vector<8x128xf32>,
    return
  }
  func.func @transform_0(%arg0: i32) -> (i32, i32) {
    %c0_i32 = arith.constant 0 : i32
    %c0_i32_0 = arith.constant 0 : i32
    return %arg0, %c0_i32 : i32, i32
  }
  func.func @transform_1(%arg0: i32) -> (i32, i32) {
    %c0_i32 = arith.constant 0 : i32
    %c0_i32_0 = arith.constant 0 : i32
    %c0_i32_1 = arith.constant 0 : i32
    return %c0_i32, %c0_i32_0 : i32, i32
  }
  func.func @transform_2(%arg0: i32) -> (i32, i32) {
    %c0_i32 = arith.constant 0 : i32
    %c0_i32_0 = arith.constant 0 : i32
    %c0_i32_1 = arith.constant 0 : i32
    return %c0_i32, %c0_i32_0 : i32, i32
  }
  func.func @transform_3(%arg0: i32) -> (i32, i32) {
    %c0_i32 = arith.constant 0 : i32
    %c0_i32_0 = arith.constant 0 : i32
    %c0_i32_1 = arith.constant 0 : i32
    return %c0_i32, %c0_i32_0 : i32, i32
  }
  func.func @transform_4(%arg0: i32) -> (i32, i32) {
    %c0_i32 = arith.constant 0 : i32
    %c0_i32_0 = arith.constant 0 : i32
    %c0_i32_1 = arith.constant 0 : i32
    return %c0_i32, %c0_i32_0 : i32, i32
  }
  func.func @transform_5(%arg0: i32) -> (i32, i32) {
    %c0_i32 = arith.constant 0 : i32
    %c0_i32_0 = arith.constant 0 : i32
    %c0_i32_1 = arith.constant 0 : i32
    return %c0_i32, %c0_i32_0 : i32, i32
  }
  func.func @transform_6(%arg0: i32) -> (i32, i32) {
    %c0_i32 = arith.constant 0 : i32
    %c0_i32_0 = arith.constant 0 : i32
    %c0_i32_1 = arith.constant 0 : i32
    return %c0_i32, %c0_i32_0 : i32, i32
  }
  func.func @transform_7(%arg0: i32) -> (i32, i32) {
    %c0_i32 = arith.constant 0 : i32
    %c0_i32_0 = arith.constant 0 : i32
    %c0_i32_1 = arith.constant 0 : i32
    return %c0_i32, %c0_i32_0 : i32, i32
  }
  func.func @transform_8(%arg0: i32) -> (i32, i32) {
    %c0_i32 = arith.constant 0 : i32
    %c0_i32_0 = arith.constant 0 : i32
    %c0_i32_1 = arith.constant 0 : i32
    return %c0_i32, %c0_i32_0 : i32, i32
  }
  func.func @transform_9(%arg0: i32) -> (i32, i32) {
    %c0_i32 = arith.constant 0 : i32
    %c0_i32_0 = arith.constant 0 : i32
    return %arg0, %c0_i32 : i32, i32
  }
}

</mosaic_0001>

<bundles_post_ra>
// kernel: tpu_custom_call.1
= control target key start
LH: loop header
LB: loop body
LE: loop exit
PB: predicated region body
PF: predicated region fallthrough
CT: control target
= control target key end

     0   :  { %14 = vsyncpa [#allocation3], 0  ;;  %s1876_s0 = inlined_call_operand.hbm [shape: f32[8,64], index: 0, kind: input, shape index: {}]   ;;  %s1877_s1 = inlined_call_operand.hbm [shape: bf16[64,512], index: 1, kind: input, shape index: {}]   ;;  %s1878_s2 = inlined_call_operand.hbm [shape: f32[1,512], index: 2, kind: input, shape index: {}]   ;;  %s1879_s3 = inlined_call_operand.hbm [shape: bf16[512,256], index: 3, kind: input, shape index: {}]   ;;  %s1880_s4 = inlined_call_operand.vmem [shape: f32[1,256], index: 4, kind: input, shape index: {}]   ;;  %s1881_s5 = inlined_call_operand.hbm [shape: bf16[256,128], index: 5, kind: input, shape index: {}]   ;;  %s1882_s6 = inlined_call_operand.vmem [shape: f32[1,128], index: 6, kind: input, shape index: {}]   ;;  %s1883_s7 = inlined_call_operand.hbm [shape: bf16[128,128], index: 7, kind: input, shape index: {}]   ;;  %s1884_s8 = inlined_call_operand.vmem [shape: f32[1,128], index: 8, kind: input, shape index: {}]   ;;  %s1885_s9 = inlined_call_operand.hbm [shape: f32[8,128], index: 9, kind: output, shape index: {}]  }
   0x1   :  { %15 = vsyncpa [#allocation6], 0 }
   0x2   :  { %16 = vsyncpa [#allocation9], 0 }
   0x3   :  { %17 = vsyncpa [#allocation12], 0  ;;  %s34_s11 = sshll.u32 %s1877_s1, 4  ;;  %s35_s11 = int_to_ptr.hbm [resolvable:$true] %s34_s11 }
   0x4   :  { %18 = vsyncpa [#allocation4], 0  ;;  %s1773_s12 = smov [#allocation5]   ;;  %s58_s16 = sshll.u32 %s1879_s3, 4  ;;  %s59_s16 = int_to_ptr.hbm [resolvable:$true] %s58_s16 }
   0x5   :  { %s36_s13 = sshll.u32 %s1773_s12, 4  ;;  %s1774_s17 = smov 256   ;;  %s37_s13 = int_to_ptr.vmem [resolvable:$true] %s36_s13 }
   0x6   :  { %s1775_s18 = smov 16   ;;  %s1776_s19 = smov [#allocation8]  }
   0x7   :  { %42 = dma.hbm_to_vmem [thread:$0]  %s35_s11, 2048, %s37_s13, [#allocation6], %s1774_s17, %s1774_s17, %s1775_s18  }
   0x8   :  { %s60_s20 = sshll.u32 %s1776_s19, 4  ;;  %s1777_s21 = smov 128   ;;  %s61_s20 = int_to_ptr.vmem [resolvable:$true] %s60_s20 }
   0x9   :  { %s1778_s22 = smov 8   ;;  %s24_s24 = sshll.u32 %s1876_s0, 4  ;;  %s25_s24 = int_to_ptr.hbm [resolvable:$true] %s24_s24 }
   0xa   :  { %66 = dma.hbm_to_vmem [thread:$0]  %s59_s16, 8192, %s61_s20, [#allocation9], %s1777_s21, %s1777_s21, %s1778_s22  }
   0xb   :  { %s1779_s25 = smov [#allocation2]   ;;  %s48_s28 = sshll.u32 %s1878_s2, 4  ;;  %s49_s28 = int_to_ptr.hbm [resolvable:$true] %s48_s28 }
   0xc   :  { %s26_s26 = sshll.u32 %s1779_s25, 4  ;;  %s1780_s29 = smov [#allocation7]   ;;  %s27_s26 = int_to_ptr.vmem [resolvable:$true] %s26_s26 }
   0xd   :  { %29 = dma.hbm_to_vmem [thread:$0]  %s25_s24, 128, %s27_s26, [#allocation3]  }
   0xe   :  { %s50_s30 = sshll.u32 %s1780_s29, 4  ;;  %s73_s12 = sshll.u32 %s1881_s5, 4  ;;  %s51_s30 = int_to_ptr.vmem [resolvable:$true] %s50_s30  ;;  %s74_s12 = int_to_ptr.hbm [resolvable:$true] %s73_s12 }
   0xf   :  { %53 = dma.hbm_to_vmem [thread:$0]  %s49_s28, 64, %s51_s30, [#allocation6]  }
  0x10   :  { %s1781_s0 = smov [#allocation10]   ;;  %s88_s16 = sshll.u32 %s1883_s7, 4  ;;  %s89_s16 = int_to_ptr.hbm [resolvable:$true] %s88_s16 }
  0x11   :  { %s75_s13 = sshll.u32 %s1781_s0, 4  ;;  %s1782_s17 = smov 64   ;;  %s76_s13 = int_to_ptr.vmem [resolvable:$true] %s75_s13 }
  0x12   :  { %s1783_s2 = smov 4   ;;  %s1784_s18 = smov [#allocation11]  }
  0x13   :  { %81 = dma.hbm_to_vmem [thread:$0]  %s74_s12, 2048, %s76_s13, [#allocation9], %s1782_s17, %s1782_s17, %s1783_s2  }
  0x14   :  { %s90_s19 = sshll.u32 %s1784_s18, 4  ;;  %s91_s19 = int_to_ptr.vmem [resolvable:$true] %s90_s19 }
  0x15   :  { %96 = dma.hbm_to_vmem [thread:$0]  %s89_s16, 1024, %s91_s19, [#allocation12], %s1782_s17, %s1782_s17, %s1783_s2  }
  0x16   :  { %1763 = dma.done.wait [#allocation3], 128  }
  0x17   :  { %1764 = vsyncadd [#allocation3], 4294967168 }
  0x18   :  { %1765 = dma.done.wait [#allocation6], 2112  }
  0x19   :  { %1766 = vsyncadd [#allocation6], 4294965184 }
  0x1a   :  { %1767 = dma.done.wait [#allocation9], 10240  }
  0x1b   :  { %1768 = vsyncadd [#allocation9], 4294957056 }
  0x1c   :  { %1769 = dma.done.wait [#allocation12], 1024  }
  0x1d   :  { %1770 = vsyncadd [#allocation12], 4294966272  ;;  %v1106_v0 = vld [vmem:[#allocation5 + $0x60] sm:$0xf]  ;;  %v1490_v1 = vld [vmem:[#allocation5 + $0x6c] sm:$0xf0] }
  0x1e   :  { %v1488_v2 = vld [vmem:[#allocation5 + $0x64] sm:$0xf]  ;;  %v1107_v3 = vor.u32 %v1490_v1, %v1106_v0  ;;  %v1108_v4 = vld [vmem:[#allocation5 + $0x70] sm:$0xf0]  ;;  %v1114_v5 = vld [vmem:[#allocation5 + $0x68] sm:$0xf] }
  0x1f   :  { %v1491_v6 = vld [vmem:[#allocation5 + $0x74] sm:$0xf0]  ;;  %v1111_v7 = vor.u32 %v1488_v2, %v1108_v4  ;;  %v1090_v9 = vld [vmem:[#allocation5 + $0x40] sm:$0xf]  ;;  %v1486_v10 = vld [vmem:[#allocation5 + $0x4c] sm:$0xf0] }
  0x20   :  { %v1115_v8 = vor.u32 %v1491_v6, %v1114_v5  ;;  %v1484_v11 = vld [vmem:[#allocation5 + $0x44] sm:$0xf]  ;;  %240 = vmatpush.bf16.msra.mxu3 %v1107_v3  ;;  %v1091_v12 = vor.u32 %v1486_v10, %v1090_v9  ;;  %v1092_v13 = vld [vmem:[#allocation5 + $0x50] sm:$0xf0]  ;;  %v1098_v14 = vld [vmem:[#allocation5 + $0x48] sm:$0xf] }
  0x21   :  { %v1487_v15 = vld [vmem:[#allocation5 + $0x54] sm:$0xf0]  ;;  %253 = vmatpush.bf16.msra.mxu1 %v1111_v7  ;;  %v1095_v16 = vor.u32 %v1484_v11, %v1092_v13  ;;  %v1074_v18 = vld [vmem:[#allocation5 + $0x20] sm:$0xf]  ;;  %v1482_v19 = vld [vmem:[#allocation5 + $0x2c] sm:$0xf0] }
  0x22   :  { %266 = vmatpush.bf16.msra.mxu2 %v1115_v8  ;;  %v1099_v17 = vor.u32 %v1487_v15, %v1098_v14  ;;  %v1480_v20 = vld [vmem:[#allocation5 + $0x24] sm:$0xf]  ;;  %v1076_v21 = vld [vmem:[#allocation5 + $0x30] sm:$0xf0]  ;;  %v1082_v22 = vld [vmem:[#allocation5 + $0x28] sm:$0xf]  ;;  %v1075_v24 = vor.u32 %v1482_v19, %v1074_v18 }
  0x23   :  { %v1483_v23 = vld [vmem:[#allocation5 + $0x34] sm:$0xf0]  ;;  %v1079_v25 = vor.u32 %v1480_v20, %v1076_v21  ;;  %v1058_v27 = vld [vmem:[#allocation5] sm:$0xf]  ;;  %v1478_v28 = vld [vmem:[#allocation5 + $0xc] sm:$0xf0] }
  0x24   :  { %241 = vmatpush.bf16.msra.mxu3 %v1091_v12  ;;  %v1083_v26 = vor.u32 %v1483_v23, %v1082_v22  ;;  %v1476_v29 = vld [vmem:[#allocation5 + $0x4] sm:$0xf]  ;;  %v1060_v30 = vld [vmem:[#allocation5 + $0x10] sm:$0xf0]  ;;  %v1066_v31 = vld [vmem:[#allocation5 + $0x8] sm:$0xf]  ;;  %v1059_v35 = vor.u32 %v1478_v28, %v1058_v27 }
  0x25   :  { %254 = vmatpush.bf16.msra.mxu1 %v1095_v16  ;;  %v1479_v32 = vld [vmem:[#allocation5 + $0x14] sm:$0xf0]  ;;  %v1489_v33 = vld [vmem:[#allocation5 + $0x6c] sm:$0xf]  ;;  %v1116_v34 = vld [vmem:[#allocation5 + $0x78] sm:$0xf0]  ;;  %v1063_v39 = vor.u32 %v1476_v29, %v1060_v30 }
  0x26   :  { %267 = vmatpush.bf16.msra.mxu2 %v1099_v17  ;;  %v124_v36 = vld [vmem:[#allocation2] sm:$0xff]  ;;  %v1246_v37 = vld [vmem:[#allocation8 + $0xf0] sm:$0xf]  ;;  %v1067_v40 = vor.u32 %v1479_v32, %v1066_v31  ;;  %v1485_v41 = vld [vmem:[#allocation5 + $0x4c] sm:$0xf]  ;;  %v1119_v45 = vor.u32 %v1489_v33, %v1116_v34  ;;  %vm232_vm0 = vcmask 523264  }
  0x27   :  { %v1523_v38 = vld [vmem:[#allocation8 + $0xf4] sm:$0xf0]  ;;  %v1182_v43 = vld [vmem:[#allocation8 + $0x70] sm:$0xf]  ;;  %v1238_v47 = vld [vmem:[#allocation8 + $0xe0] sm:$0xf]  ;;  %v1854_v51 = vpack.c.bf16 %v124_v36, %v124_v36 }
  0x28   :  { %242 = vmatpush.bf16.msra.mxu3 %v1075_v24  ;;  %v1100_v42 = vld [vmem:[#allocation5 + $0x58] sm:$0xf0]  ;;  %v1247_v46 = vor.u32 %v1523_v38, %v1246_v37  ;;  %v1310_v49 = vld [vmem:[#allocation8 + $0x170] sm:$0xf]  ;;  %v1521_v52 = vld [vmem:[#allocation8 + $0xe4] sm:$0xf0] }
  0x29   :  { %255 = vmatpush.bf16.msra.mxu1 %v1079_v25  ;;  %v1507_v44 = vld [vmem:[#allocation8 + $0x74] sm:$0xf0]  ;;  %v1174_v54 = vld [vmem:[#allocation8 + $0x60] sm:$0xf]  ;;  %v1505_v55 = vld [vmem:[#allocation8 + $0x64] sm:$0xf0]  ;;  %v1103_v59 = vor.u32 %v1485_v41, %v1100_v42  ;;  %v1239_v61 = vor.u32 %v1521_v52, %v1238_v47 }
  0x2a   :  { %268 = vmatpush.bf16.msra.mxu2 %v1083_v26  ;;  %v1183_v48 = vor.u32 %v1507_v44, %v1182_v43  ;;  %v1539_v50 = vld [vmem:[#allocation8 + $0x174] sm:$0xf0]  ;;  %v1302_v56 = vld [vmem:[#allocation8 + $0x160] sm:$0xf]  ;;  %v1537_v57 = vld [vmem:[#allocation8 + $0x164] sm:$0xf0]  ;;  %v1175_v58 = vor.u32 %v1505_v55, %v1174_v54 }
  0x2b   :  { %v1311_v53 = vor.u32 %v1539_v50, %v1310_v49  ;;  %v1481_v60 = vld [vmem:[#allocation5 + $0x2c] sm:$0xf]  ;;  %v1166_v62 = vld [vmem:[#allocation8 + $0x50] sm:$0xf]  ;;  %v1503_v63 = vld [vmem:[#allocation8 + $0x54] sm:$0xf0]  ;;  %v1303_v3 = vor.u32 %v1537_v57, %v1302_v56 }
  0x2c   :  { %243 = vmatpush.bf16.msra.mxu3 %v1059_v35  ;;  %686 = vmatpush.bf16.msra.mxu0 %v1183_v48  ;;  %v1084_v0 = vld [vmem:[#allocation5 + $0x38] sm:$0xf0]  ;;  %v1230_v1 = vld [vmem:[#allocation8 + $0xd0] sm:$0xf]  ;;  %v1477_v6 = vld [vmem:[#allocation5 + $0xc] sm:$0xf]  ;;  %v1167_v7 = vor.u32 %v1503_v63, %v1166_v62 }
  0x2d   :  { %256 = vmatpush.bf16.msra.mxu1 %v1063_v39  ;;  %v1519_v2 = vld [vmem:[#allocation8 + $0xd4] sm:$0xf0]  ;;  %v1294_v4 = vld [vmem:[#allocation8 + $0x150] sm:$0xf]  ;;  %v1087_v8 = vor.u32 %v1481_v60, %v1084_v0  ;;  %v1158_v11 = vld [vmem:[#allocation8 + $0x40] sm:$0xf] }
  0x2e   :  { %269 = vmatpush.bf16.msra.mxu2 %v1067_v40  ;;  %v1535_v5 = vld [vmem:[#allocation8 + $0x154] sm:$0xf0]  ;;  %v1231_v10 = vor.u32 %v1519_v2, %v1230_v1  ;;  %v1501_v12 = vld [vmem:[#allocation8 + $0x44] sm:$0xf0]  ;;  %v1222_v13 = vld [vmem:[#allocation8 + $0xc0] sm:$0xf] }
  0x2f   :  { %1120 = vmatmul.msk.bf16.vlgmr.msra.gmra.mxu3 %vm232_vm0, %v1854_v51  ;;  %v1068_v9 = vld [vmem:[#allocation5 + $0x18] sm:$0xf0]  ;;  %v1517_v14 = vld [vmem:[#allocation8 + $0xc4] sm:$0xf0]  ;;  %v1295_v15 = vor.u32 %v1535_v5, %v1294_v4  ;;  %v1286_v16 = vld [vmem:[#allocation8 + $0x140] sm:$0xf]  ;;  %v1159_v20 = vor.u32 %v1501_v12, %v1158_v11 }
  0x30   :  { %279 = vmatpush.bf16.msrb.mxu3 %v1119_v45  ;;  %1121 = vmatmul.msk.bf16.vlgmr.msra.gmra.mxu1 %vm232_vm0, %v1854_v51  ;;  %v1533_v17 = vld [vmem:[#allocation8 + $0x144] sm:$0xf0]  ;;  %v1374_v18 = vld [vmem:[#allocation8 + $0x1f0] sm:$0xf]  ;;  %v1555_v19 = vld [vmem:[#allocation8 + $0x1f4] sm:$0xf0]  ;;  %v1071_v21 = vor.u32 %v1477_v6, %v1068_v9  ;;  %v1223_v22 = vor.u32 %v1517_v14, %v1222_v13 }
  0x31   :  { %699 = vmatpush.bf16.msrb.mxu1 %v1247_v46  ;;  %1122 = vmatmul.msk.bf16.vlgmr.msra.gmra.mxu2 %vm232_vm0, %v1854_v51  ;;  %v1150_v23 = vld [vmem:[#allocation8 + $0x30] sm:$0xf]  ;;  %v1499_v24 = vld [vmem:[#allocation8 + $0x34] sm:$0xf0]  ;;  %v1287_v27 = vor.u32 %v1533_v17, %v1286_v16  ;;  %v1375_v28 = vor.u32 %v1555_v19, %v1374_v18  ;;  %v1366_v32 = vld [vmem:[#allocation8 + $0x1e0] sm:$0xf] }
  0x32   :  { %712 = vmatpush.bf16.msrb.mxu2 %v1311_v53  ;;  %687 = vmatpush.bf16.msra.mxu0 %v1175_v58  ;;  %v1214_v25 = vld [vmem:[#allocation8 + $0xb0] sm:$0xf]  ;;  %v1515_v26 = vld [vmem:[#allocation8 + $0xb4] sm:$0xf0]  ;;  %v1151_v31 = vor.u32 %v1499_v24, %v1150_v23  ;;  %v1553_v33 = vld [vmem:[#allocation8 + $0x1e4] sm:$0xf0] }
  0x33   :  { %v1278_v29 = vld [vmem:[#allocation8 + $0x130] sm:$0xf]  ;;  %v1531_v30 = vld [vmem:[#allocation8 + $0x134] sm:$0xf0]  ;;  %v1215_v34 = vor.u32 %v1515_v26, %v1214_v25  ;;  %v1142_v35 = vld [vmem:[#allocation8 + $0x20] sm:$0xf]  ;;  %v1367_v42 = vor.u32 %v1553_v33, %v1366_v32 }
  0x34   :  { %280 = vmatpush.bf16.msrb.mxu3 %v1103_v59  ;;  %v1497_v36 = vld [vmem:[#allocation8 + $0x24] sm:$0xf0]  ;;  %v1206_v37 = vld [vmem:[#allocation8 + $0xa0] sm:$0xf]  ;;  %v1279_v39 = vor.u32 %v1531_v30, %v1278_v29  ;;  %v1358_v44 = vld [vmem:[#allocation8 + $0x1d0] sm:$0xf] }
  0x35   :  { %700 = vmatpush.bf16.msrb.mxu1 %v1239_v61  ;;  %v1513_v38 = vld [vmem:[#allocation8 + $0xa4] sm:$0xf0]  ;;  %v1270_v40 = vld [vmem:[#allocation8 + $0x120] sm:$0xf]  ;;  %v1143_v43 = vor.u32 %v1497_v36, %v1142_v35  ;;  %v1551_v45 = vld [vmem:[#allocation8 + $0x1d4] sm:$0xf0] }
  0x36   :  { %713 = vmatpush.bf16.msrb.mxu2 %v1303_v3  ;;  %688 = vmatpush.bf16.msra.mxu0 %v1167_v7  ;;  %v1529_v41 = vld [vmem:[#allocation8 + $0x124] sm:$0xf0]  ;;  %v1207_v46 = vor.u32 %v1513_v38, %v1206_v37  ;;  %v1134_v47 = vld [vmem:[#allocation8 + $0x10] sm:$0xf]  ;;  %v1495_v48 = vld [vmem:[#allocation8 + $0x14] sm:$0xf0]  ;;  %v1359_v55 = vor.u32 %v1551_v45, %v1358_v44 }
  0x37   :  { %v1198_v49 = vld [vmem:[#allocation8 + $0x90] sm:$0xf]  ;;  %v1511_v50 = vld [vmem:[#allocation8 + $0x94] sm:$0xf0]  ;;  %v1271_v52 = vor.u32 %v1529_v41, %v1270_v40  ;;  %v1190_v56 = vld [vmem:[#allocation8 + $0x80] sm:$0xf]  ;;  %v1135_v57 = vor.u32 %v1495_v48, %v1134_v47 }
  0x38   :  { %281 = vmatpush.bf16.msrb.mxu3 %v1087_v8  ;;  %v1262_v53 = vld [vmem:[#allocation8 + $0x110] sm:$0xf]  ;;  %v1527_v54 = vld [vmem:[#allocation8 + $0x114] sm:$0xf0]  ;;  %v1350_v58 = vld [vmem:[#allocation8 + $0x1c0] sm:$0xf]  ;;  %v1199_v60 = vor.u32 %v1511_v50, %v1198_v49 }
  0x39   :  { %701 = vmatpush.bf16.msrb.mxu1 %v1231_v10  ;;  %v1549_v59 = vld [vmem:[#allocation8 + $0x1c4] sm:$0xf0]  ;;  %v1126_v62 = vld [vmem:[#allocation8] sm:$0xf]  ;;  %v1263_v0 = vor.u32 %v1527_v54, %v1262_v53  ;;  %v1506_v1 = vld [vmem:[#allocation8 + $0x74] sm:$0xf] }
  0x3a   :  { %714 = vmatpush.bf16.msrb.mxu2 %v1295_v15  ;;  %689 = vmatpush.bf16.msra.mxu0 %v1159_v20  ;;  %v1509_v61 = vld [vmem:[#allocation8 + $0x84] sm:$0xf0]  ;;  %v1184_v2 = vld [vmem:[#allocation8 + $0x78] sm:$0xf0]  ;;  %v1254_v4 = vld [vmem:[#allocation8 + $0x100] sm:$0xf]  ;;  %v1351_v6 = vor.u32 %v1549_v59, %v1350_v58 }
  0x3b   :  { %v1493_v63 = vld [vmem:[#allocation8 + $0x4] sm:$0xf0]  ;;  %v1248_v3 = vld [vmem:[#allocation8 + $0xf8] sm:$0xf0]  ;;  %v1538_v8 = vld [vmem:[#allocation8 + $0x174] sm:$0xf]  ;;  %v1191_v10 = vor.u32 %v1509_v61, %v1190_v56  ;;  %v1187_v11 = vor.u32 %v1506_v1, %v1184_v2 }
  0x3c   :  { %282 = vmatpush.bf16.msrb.mxu3 %v1071_v21  ;;  %v1525_v5 = vld [vmem:[#allocation8 + $0x104] sm:$0xf0]  ;;  %v1127_v7 = vor.u32 %v1493_v63, %v1126_v62  ;;  %v1312_v9 = vld [vmem:[#allocation8 + $0x178] sm:$0xf0]  ;;  %v1520_v14 = vld [vmem:[#allocation8 + $0xe4] sm:$0xf] }
  0x3d   :  { %702 = vmatpush.bf16.msrb.mxu1 %v1223_v22  ;;  %v1255_v13 = vor.u32 %v1525_v5, %v1254_v4  ;;  %v1240_v15 = vld [vmem:[#allocation8 + $0xe8] sm:$0xf0]  ;;  %v1315_v16 = vor.u32 %v1538_v8, %v1312_v9  ;;  %v1518_v18 = vld [vmem:[#allocation8 + $0xd4] sm:$0xf]  ;;  %v1232_v19 = vld [vmem:[#allocation8 + $0xd8] sm:$0xf0] }
  0x3e   :  { %715 = vmatpush.bf16.msrb.mxu2 %v1287_v27  ;;  %690 = vmatpush.bf16.msra.mxu0 %v1151_v31  ;;  %v1243_v17 = vor.u32 %v1520_v14, %v1240_v15  ;;  %v1235_v20 = vor.u32 %v1518_v18, %v1232_v19  ;;  %v1342_v21 = vld [vmem:[#allocation8 + $0x1b0] sm:$0xf]  ;;  %v1547_v22 = vld [vmem:[#allocation8 + $0x1b4] sm:$0xf0]  ;;  %v1504_v24 = vld [vmem:[#allocation8 + $0x64] sm:$0xf] }
  0x3f   :  { %1123 = vmatmul.msk.bf16.vlgmr.msrb.gmra.mxu3 %vm232_vm0, %v1854_v51  ;;  %v1522_v51 = vld [vmem:[#allocation8 + $0xf4] sm:$0xf]  ;;  %v1343_v23 = vor.u32 %v1547_v22, %v1342_v21  ;;  %v1176_v25 = vld [vmem:[#allocation8 + $0x68] sm:$0xf0]  ;;  %v1536_v26 = vld [vmem:[#allocation8 + $0x164] sm:$0xf] }
  0x40   :  { %725 = vmatpush.bf16.msra.mxu3 %v1375_v28  ;;  %v1251_v12 = vor.u32 %v1522_v51, %v1248_v3  ;;  %v1179_v27 = vor.u32 %v1504_v24, %v1176_v25  ;;  %v1304_v28 = vld [vmem:[#allocation8 + $0x168] sm:$0xf0]  ;;  %v1516_v30 = vld [vmem:[#allocation8 + $0xc4] sm:$0xf]  ;;  %v1334_v33 = vld [vmem:[#allocation8 + $0x1a0] sm:$0xf] }
  0x41   :  { %703 = vmatpush.bf16.msrb.mxu1 %v1215_v34  ;;  %v1307_v29 = vor.u32 %v1536_v26, %v1304_v28  ;;  %v1224_v31 = vld [vmem:[#allocation8 + $0xc8] sm:$0xf0]  ;;  %v1545_v34 = vld [vmem:[#allocation8 + $0x1a4] sm:$0xf0]  ;;  %v1502_v36 = vld [vmem:[#allocation8 + $0x54] sm:$0xf] }
  0x42   :  { %716 = vmatpush.bf16.msrb.mxu2 %v1279_v39  ;;  %691 = vmatpush.bf16.msra.mxu0 %v1143_v43  ;;  %v1227_v32 = vor.u32 %v1516_v30, %v1224_v31  ;;  %v1335_v35 = vor.u32 %v1545_v34, %v1334_v33  ;;  %v1168_v37 = vld [vmem:[#allocation8 + $0x58] sm:$0xf0]  ;;  %v1534_v38 = vld [vmem:[#allocation8 + $0x154] sm:$0xf]  ;;  %v1326_v45 = vld [vmem:[#allocation8 + $0x190] sm:$0xf] }
  0x43   :  { %v1171_v39 = vor.u32 %v1502_v36, %v1168_v37  ;;  %v1296_v40 = vld [vmem:[#allocation8 + $0x158] sm:$0xf0]  ;;  %v1500_v48 = vld [vmem:[#allocation8 + $0x44] sm:$0xf]  ;;  %v1160_v49 = vld [vmem:[#allocation8 + $0x48] sm:$0xf0] }
  0x44   :  { %726 = vmatpush.bf16.msra.mxu3 %v1367_v42  ;;  %v1299_v41 = vor.u32 %v1534_v38, %v1296_v40  ;;  %v1514_v42 = vld [vmem:[#allocation8 + $0xb4] sm:$0xf]  ;;  %v1216_v43 = vld [vmem:[#allocation8 + $0xb8] sm:$0xf0]  ;;  %v1532_v50 = vld [vmem:[#allocation8 + $0x144] sm:$0xf] }
  0x45   :  { %704 = vmatpush.bf16.msrb.mxu1 %v1207_v46  ;;  %v1219_v44 = vor.u32 %v1514_v42, %v1216_v43  ;;  %v1543_v46 = vld [vmem:[#allocation8 + $0x194] sm:$0xf0]  ;;  %v1288_v53 = vld [vmem:[#allocation8 + $0x148] sm:$0xf0]  ;;  %v1318_v58 = vld [vmem:[#allocation8 + $0x180] sm:$0xf] }
  0x46   :  { %717 = vmatpush.bf16.msrb.mxu2 %v1271_v52  ;;  %692 = vmatpush.bf16.msra.mxu0 %v1135_v57  ;;  %v1327_v47 = vor.u32 %v1543_v46, %v1326_v45  ;;  %v1163_v52 = vor.u32 %v1500_v48, %v1160_v49  ;;  %v1291_v54 = vor.u32 %v1532_v50, %v1288_v53  ;;  %v1208_v56 = vld [vmem:[#allocation8 + $0xa8] sm:$0xf0]  ;;  %v1541_v59 = vld [vmem:[#allocation8 + $0x184] sm:$0xf0]  ;;  %v1498_v61 = vld [vmem:[#allocation8 + $0x34] sm:$0xf] }
  0x47   :  { %v1152_v62 = vld [vmem:[#allocation8 + $0x38] sm:$0xf0]  ;;  %v1530_v63 = vld [vmem:[#allocation8 + $0x134] sm:$0xf]  ;;  %v1144_v9 = vld [vmem:[#allocation8 + $0x28] sm:$0xf0] }
  0x48   :  { %727 = vmatpush.bf16.msra.mxu3 %v1359_v55  ;;  %v1512_v55 = vld [vmem:[#allocation8 + $0xa4] sm:$0xf]  ;;  %v1155_v51 = vor.u32 %v1498_v61, %v1152_v62  ;;  %v1554_v1 = vld [vmem:[#allocation8 + $0x1f4] sm:$0xf]  ;;  %v1376_v2 = vld [vmem:[#allocation8 + $0x1f8] sm:$0xf0] }
  0x49   :  { %705 = vmatpush.bf16.msrb.mxu1 %v1199_v60  ;;  %v1211_v57 = vor.u32 %v1512_v55, %v1208_v56  ;;  %v1319_v60 = vor.u32 %v1541_v59, %v1318_v58  ;;  %v1379_v4 = vor.u32 %v1554_v1, %v1376_v2  ;;  %v1510_v5 = vld [vmem:[#allocation8 + $0x94] sm:$0xf]  ;;  %v1552_v14 = vld [vmem:[#allocation8 + $0x1e4] sm:$0xf]  ;;  %v1368_v15 = vld [vmem:[#allocation8 + $0x1e8] sm:$0xf0] }
  0x4a   :  { %718 = vmatpush.bf16.msrb.mxu2 %v1263_v0  ;;  %693 = vmatpush.bf16.msra.mxu0 %v1127_v7  ;;  %v1280_v0 = vld [vmem:[#allocation8 + $0x138] sm:$0xf0]  ;;  %v1496_v7 = vld [vmem:[#allocation8 + $0x24] sm:$0xf]  ;;  %v1192_v18 = vld [vmem:[#allocation8 + $0x88] sm:$0xf0] }
  0x4b   :  { %v1283_v3 = vor.u32 %v1530_v63, %v1280_v0  ;;  %v1136_v21 = vld [vmem:[#allocation8 + $0x18] sm:$0xf0]  ;;  %v1526_v22 = vld [vmem:[#allocation8 + $0x114] sm:$0xf]  ;;  %v1128_v30 = vld [vmem:[#allocation8 + $0x8] sm:$0xf0] }
  0x4c   :  { %728 = vmatpush.bf16.msra.mxu3 %v1351_v6  ;;  %v1200_v6 = vld [vmem:[#allocation8 + $0x98] sm:$0xf0]  ;;  %v1550_v25 = vld [vmem:[#allocation8 + $0x1d4] sm:$0xf]  ;;  %v1524_v31 = vld [vmem:[#allocation8 + $0x104] sm:$0xf] }
  0x4d   :  { %706 = vmatpush.bf16.msrb.mxu1 %v1191_v10  ;;  %v1203_v8 = vor.u32 %v1510_v5, %v1200_v6  ;;  %v1528_v10 = vld [vmem:[#allocation8 + $0x124] sm:$0xf]  ;;  %v1264_v24 = vld [vmem:[#allocation8 + $0x118] sm:$0xf0]  ;;  %v1256_v33 = vld [vmem:[#allocation8 + $0x108] sm:$0xf0] }
  0x4e   :  { %738 = vmatpush.bf16.msrb.mxu0 %v1187_v11  ;;  %719 = vmatpush.bf16.msrb.mxu2 %v1255_v13  ;;  %v1272_v11 = vld [vmem:[#allocation8 + $0x128] sm:$0xf0]  ;;  %v1360_v26 = vld [vmem:[#allocation8 + $0x1d8] sm:$0xf0]  ;;  %v1548_v34 = vld [vmem:[#allocation8 + $0x1c4] sm:$0xf]  ;;  %v1259_v36 = vor.u32 %v1524_v31, %v1256_v33 }
  0x4f   :  { %v1275_v13 = vor.u32 %v1528_v10, %v1272_v11  ;;  %v1363_v28 = vor.u32 %v1550_v25, %v1360_v26  ;;  %v142_v38 = vld [vmem:[#allocation7] sm:$0xf]  ;;  %v1544_v43 = vld [vmem:[#allocation8 + $0x1a4] sm:$0xf]  ;;  %v1320_v56 = vld [vmem:[#allocation8 + $0x188] sm:$0xf0] }
  0x50   :  { %729 = vmatpush.bf16.msra.mxu3 %v1343_v23  ;;  %v1344_v40 = vld [vmem:[#allocation8 + $0x1b8] sm:$0xf0]  ;;  %v145_v42 = vperm.slane %v142_v38, 1  ;;  %v144_v50 = vperm.slane %v142_v38, 0  ;;  %v146_v53 = vperm.slane %v142_v38, 2  ;;  %v147_v5 = vperm.slane %v142_v38, 3 }
  0x51   :  { %751 = vmatpush.bf16.msra.mxu1 %v1251_v12  ;;  %v1147_v12 = vor.u32 %v1496_v7, %v1144_v9  ;;  %v1328_v48 = vld [vmem:[#allocation8 + $0x198] sm:$0xf0]  ;;  %v1540_v55 = vld [vmem:[#allocation8 + $0x184] sm:$0xf]  ;;  %v1566_v25 = vld [vmem:[#allocation10 + $0x50] sm:$0xff]  ;;  %s1785_s1 = smov [#allocation13]  }
  0x52   :  { %764 = vmatpush.bf16.msra.mxu2 %v1315_v16  ;;  %739 = vmatpush.bf16.msrb.mxu0 %v1179_v27  ;;  %v1508_v16 = vld [vmem:[#allocation8 + $0x84] sm:$0xf]  ;;  %v1267_v27 = vor.u32 %v1526_v22, %v1264_v24  ;;  %v1323_v62 = vor.u32 %v1540_v55, %v1320_v56  ;;  %v1563_v11 = vld [vmem:[#allocation10 + $0x38] sm:$0xff]  ;;  %s1041_s23 = sshll.u32 %s1785_s1, 4  ;;  %s1043_s26 = sshll.u32 %s1885_s9, 4  ;;  %s1042_s23 = int_to_ptr.vmem [resolvable:$true] %s1041_s23  ;;  %s1044_s26 = int_to_ptr.hbm [resolvable:$true] %s1043_s26 }
  0x53   :  { %v1195_v19 = vor.u32 %v1508_v16, %v1192_v18  ;;  %v1571_v16 = vld [vmem:[#allocation10 + $0x78] sm:$0xff]  ;;  %v1570_v18 = vld [vmem:[#allocation10 + $0x70] sm:$0xff]  ;;  %v1568_v22 = vld [vmem:[#allocation10 + $0x60] sm:$0xff] }
  0x54   :  { %730 = vmatpush.bf16.msra.mxu3 %v1335_v35  ;;  %v1352_v35 = vld [vmem:[#allocation8 + $0x1c8] sm:$0xf0]  ;;  %v1567_v24 = vld [vmem:[#allocation10 + $0x58] sm:$0xff] }
  0x55   :  { %752 = vmatpush.bf16.msra.mxu1 %v1243_v17  ;;  %v1371_v17 = vor.u32 %v1552_v14, %v1368_v15  ;;  %v1355_v37 = vor.u32 %v1548_v34, %v1352_v35  ;;  %v1560_v14 = vld [vmem:[#allocation10 + $0x20] sm:$0xff]  ;;  %v1559_v15 = vld [vmem:[#allocation10 + $0x18] sm:$0xff] }
  0x56   :  { %765 = vmatpush.bf16.msra.mxu2 %v1307_v29  ;;  %740 = vmatpush.bf16.msrb.mxu0 %v1171_v39  ;;  %v1492_v29 = vld [vmem:[#allocation8 + $0x4] sm:$0xf]  ;;  %v1546_v39 = vld [vmem:[#allocation8 + $0x1b4] sm:$0xf]  ;;  %v1579_v35 = vld [vmem:[#allocation11 + $0x38] sm:$0xff] }
  0x58   :  { %731 = vmatpush.bf16.msra.mxu3 %v1327_v47  ;;  %v1542_v47 = vld [vmem:[#allocation8 + $0x194] sm:$0xf] }
  0x59   :  { %753 = vmatpush.bf16.msra.mxu1 %v1235_v20  ;;  %v1494_v20 = vld [vmem:[#allocation8 + $0x14] sm:$0xf] }
  0x5a   :  { %766 = vmatpush.bf16.msra.mxu2 %v1299_v41  ;;  %741 = vmatpush.bf16.msrb.mxu0 %v1163_v52  ;;  %v1139_v23 = vor.u32 %v1494_v20, %v1136_v21  ;;  %v1347_v41 = vor.u32 %v1546_v39, %v1344_v40  ;;  %v1569_v20 = vld [vmem:[#allocation10 + $0x68] sm:$0xff]  ;;  %v1556_v21 = vld [vmem:[#allocation10] sm:$0xff]  ;;  %v1578_v39 = vld [vmem:[#allocation11 + $0x30] sm:$0xff] }
  0x5c   :  { %732 = vmatpush.bf16.msra.mxu3 %v1319_v60 }
  0x5d   :  { %754 = vmatpush.bf16.msra.mxu1 %v1227_v32  ;;  %v1131_v32 = vor.u32 %v1492_v29, %v1128_v30  ;;  %v360_v30 = vld [vmem:[%s1880_s4] sm:$0x3] }
  0x5e   :  { %767 = vmatpush.bf16.msra.mxu2 %v1291_v54  ;;  %742 = vmatpush.bf16.msrb.mxu0 %v1155_v51  ;;  %v1331_v54 = vor.u32 %v1542_v47, %v1328_v48  ;;  %v362_v33 = vperm.slane %v360_v30, 0  ;;  %v363_v48 = vperm.slane %v360_v30, 1 }
  0x60   :  { %777 = vmatpush.bf16.msrb.mxu3 %v1379_v4 }
  0x61   :  { %755 = vmatpush.bf16.msra.mxu1 %v1219_v44  ;;  %v1336_v44 = vld [vmem:[#allocation8 + $0x1a8] sm:$0xf0] }
  0x62   :  { %768 = vmatpush.bf16.msra.mxu2 %v1283_v3  ;;  %743 = vmatpush.bf16.msrb.mxu0 %v1147_v12  ;;  %v1339_v45 = vor.u32 %v1544_v43, %v1336_v44  ;;  %v1562_v12 = vld [vmem:[#allocation10 + $0x30] sm:$0xff] }
  0x64   :  { %778 = vmatpush.bf16.msrb.mxu3 %v1371_v17  ;;  %v1558_v17 = vld [vmem:[#allocation10 + $0x10] sm:$0xff] }
  0x65   :  { %756 = vmatpush.bf16.msra.mxu1 %v1211_v57 }
  0x66   :  { %769 = vmatpush.bf16.msra.mxu2 %v1275_v13  ;;  %744 = vmatpush.bf16.msrb.mxu0 %v1139_v23  ;;  %v1561_v13 = vld [vmem:[#allocation10 + $0x28] sm:$0xff] }
  0x68   :  { %779 = vmatpush.bf16.msrb.mxu3 %v1363_v28  ;;  %v1565_v28 = vld [vmem:[#allocation10 + $0x48] sm:$0xff] }
  0x69   :  { %757 = vmatpush.bf16.msra.mxu1 %v1203_v8 }
  0x6a   :  { %770 = vmatpush.bf16.msra.mxu2 %v1267_v27  ;;  %745 = vmatpush.bf16.msrb.mxu0 %v1131_v32  ;;  %v1564_v32 = vld [vmem:[#allocation10 + $0x40] sm:$0xff] }
  0x6c   :  { %780 = vmatpush.bf16.msrb.mxu3 %v1355_v37 }
  0x6d   :  { %758 = vmatpush.bf16.msra.mxu1 %v1195_v19  ;;  %v1557_v19 = vld [vmem:[#allocation10 + $0x8] sm:$0xff] }
  0x6e   :  { %771 = vmatpush.bf16.msra.mxu2 %v1259_v36 }
  0x70   :  { %781 = vmatpush.bf16.msrb.mxu3 %v1347_v41 }
  0x74   :  { %782 = vmatpush.bf16.msrb.mxu3 %v1339_v45 }
  0x78   :  { %783 = vmatpush.bf16.msrb.mxu3 %v1331_v54 }
  0x7c   :  { %784 = vmatpush.bf16.msrb.mxu3 %v1323_v62  ;;  %v1576_v62 = vld [vmem:[#allocation11 + $0x20] sm:$0xff] }
  0xad   :  { %v258_v46 = vpop.f32.mrf.mxu1 }
  0xae   :  { %v259_v49 = vadd.f32 %v258_v46, %v145_v42 }
  0xb0   :  { %v289_v52 = vmax.f32 %v259_v49, 0.0 }
  0xb2   :  { %v293_v57 = vpack.c.bf16 %v289_v52, %v289_v52  ;;  %v245_v58 = vpop.f32.mrf.mxu3 }
  0xb3   :  { %v246_v59 = vadd.f32 %v245_v58, %v144_v50 }
  0xb4   :  { %v271_v60 = vpop.f32.mrf.mxu2  ;;  %707 = vmatmul.bf16.vlgmr.msrb.gmra.mxu1 %v293_v57 }
  0xb5   :  { %v272_v61 = vadd.f32 %v271_v60, %v146_v53  ;;  %v288_v63 = vmax.f32 %v246_v59, 0.0  ;;  %v260_v51 = vpop.f32.mrf.mxu1  ;;  %939 = vmatpush.bf16.msrb.mxu1 %v1571_v16 }
  0xb6   :  { %v1574_v51 = vld [vmem:[#allocation11 + $0x10] sm:$0xff] }
  0xb7   :  { %v290_v0 = vmax.f32 %v272_v61, 0.0  ;;  %v292_v1 = vpack.c.bf16 %v288_v63, %v288_v63  ;;  %v1577_v61 = vld [vmem:[#allocation11 + $0x28] sm:$0xff]  ;;  %v1575_v63 = vld [vmem:[#allocation11 + $0x18] sm:$0xff] }
  0xb9   :  { %v294_v2 = vpack.c.bf16 %v290_v0, %v290_v0  ;;  %694 = vmatmul.bf16.vlgmr.msra.gmra.mxu0 %v292_v1  ;;  %940 = vmatpush.bf16.msrb.mxu1 %v1570_v18  ;;  %v1573_v0 = vld [vmem:[#allocation11 + $0x8] sm:$0xff] }
  0xba   :  { %v247_v3 = vpop.f32.mrf.mxu3  ;;  %926 = vmatpush.bf16.msra.mxu0 %v1563_v11  ;;  %v1594_v11 = vld [vmem:[%s1884_s8] ss:$0 sm:$0xff] }
  0xbb   :  { %720 = vmatmul.bf16.vlgmr.msrb.gmra.mxu2 %v294_v2 }
  0xbc   :  { %v273_v4 = vpop.f32.mrf.mxu2  ;;  %1022 = vmatpush.bf16.msrb.mxu2 %v1579_v35 }
  0xbd   :  { %941 = vmatpush.bf16.msrb.mxu1 %v1569_v20  ;;  %v1593_v4 = vld [vmem:[%s1882_s6] ss:$0 sm:$0xff] }
  0xbe   :  { %927 = vmatpush.bf16.msra.mxu0 %v1562_v12 }
  0xc0   :  { %1023 = vmatpush.bf16.msrb.mxu2 %v1578_v39 }
  0xc1   :  { %942 = vmatpush.bf16.msrb.mxu1 %v1568_v22 }
  0xc2   :  { %v284_v6 = vpop.f32.mrf.mxu3  ;;  %928 = vmatpush.bf16.msra.mxu0 %v1561_v13 }
  0xc3   :  { %v285_v7 = vadd.f32 %v284_v6, %v147_v5 }
  0xc4   :  { %759 = vmatmul.bf16.vlgmr.msra.gmra.mxu1 %v293_v57  ;;  %1024 = vmatpush.bf16.msrb.mxu2 %v1577_v61 }
  0xc5   :  { %v291_v8 = vmax.f32 %v285_v7, 0.0  ;;  %943 = vmatpush.bf16.msrb.mxu1 %v1567_v24 }
  0xc6   :  { %929 = vmatpush.bf16.msra.mxu0 %v1560_v14 }
  0xc7   :  { %v295_v9 = vpack.c.bf16 %v291_v8, %v291_v8 }
  0xc8   :  { %1025 = vmatpush.bf16.msrb.mxu2 %v1576_v62 }
  0xc9   :  { %733 = vmatmul.bf16.vlgmr.msra.gmra.mxu3 %v295_v9  ;;  %746 = vmatmul.bf16.vlgmr.msrb.gmra.mxu0 %v292_v1  ;;  %v1572_v1 = vld [vmem:[#allocation11] sm:$0xff] }
  0xca   :  { %v286_v10 = vpop.f32.mrf.mxu3  ;;  %930 = vmatpush.bf16.msra.mxu0 %v1559_v15  ;;  %944 = vmatpush.bf16.msrb.mxu1 %v1566_v25 }
  0xcb   :  { %772 = vmatmul.bf16.vlgmr.msra.gmra.mxu2 %v294_v2 }
  0xcc   :  { %1026 = vmatpush.bf16.msrb.mxu2 %v1575_v63 }
  0xce   :  { %931 = vmatpush.bf16.msra.mxu0 %v1558_v17  ;;  %945 = vmatpush.bf16.msrb.mxu1 %v1565_v28 }
  0xd0   :  { %1027 = vmatpush.bf16.msrb.mxu2 %v1574_v51 }
  0xd2   :  { %932 = vmatpush.bf16.msra.mxu0 %v1557_v19  ;;  %946 = vmatpush.bf16.msrb.mxu1 %v1564_v32 }
  0xd4   :  { %1028 = vmatpush.bf16.msrb.mxu2 %v1573_v0 }
  0xd6   :  { %933 = vmatpush.bf16.msra.mxu0 %v1556_v21 }
  0xd8   :  { %1029 = vmatpush.bf16.msrb.mxu2 %v1572_v1 }
  0xd9   :  { %785 = vmatmul.bf16.vlgmr.msrb.gmra.mxu3 %v295_v9 }
 0x131   :  { %v708_v23 = vpop.f32.mrf.mxu1 }
 0x136   :  { %v695_v26 = vpop.f32.mrf.mxu0 }
 0x137   :  { %v696_v36 = vadd.f32 %v695_v26, %v362_v33 }
 0x139   :  { %v710_v27 = vpop.f32.mrf.mxu1  ;;  %v709_v40 = vadd.f32 %v708_v23, %v696_v36 }
 0x13e   :  { %v721_v29 = vpop.f32.mrf.mxu2  ;;  %v697_v31 = vpop.f32.mrf.mxu0 }
 0x13f   :  { %v722_v42 = vadd.f32 %v721_v29, %v709_v40 }
 0x141   :  { %v760_v34 = vpop.f32.mrf.mxu1 }
 0x146   :  { %v723_v37 = vpop.f32.mrf.mxu2  ;;  %v747_v38 = vpop.f32.mrf.mxu0 }
 0x147   :  { %v748_v52 = vadd.f32 %v747_v38, %v363_v48 }
 0x149   :  { %v762_v41 = vpop.f32.mrf.mxu1  ;;  %v761_v54 = vadd.f32 %v760_v34, %v748_v52 }
 0x14c   :  { %v734_v43 = vpop.f32.mrf.mxu3 }
 0x14d   :  { %v735_v44 = vadd.f32 %v734_v43, %v722_v42 }
 0x14e   :  { %v773_v45 = vpop.f32.mrf.mxu2  ;;  %v749_v46 = vpop.f32.mrf.mxu0 }
 0x14f   :  { %v790_v47 = vmax.f32 %v735_v44, 0.0  ;;  %v774_v55 = vadd.f32 %v773_v45, %v761_v54 }
 0x151   :  { %v792_v49 = vpack.c.bf16 %v790_v47, %v790_v47 }
 0x153   :  { %934 = vmatmul.bf16.vlgmr.msra.gmra.mxu0 %v792_v49 }
 0x154   :  { %v736_v50 = vpop.f32.mrf.mxu3 }
 0x156   :  { %v775_v53 = vpop.f32.mrf.mxu2 }
 0x15c   :  { %v786_v56 = vpop.f32.mrf.mxu3 }
 0x15d   :  { %v787_v57 = vadd.f32 %v786_v56, %v774_v55 }
 0x15f   :  { %v791_v58 = vmax.f32 %v787_v57, 0.0 }
 0x161   :  { %v793_v59 = vpack.c.bf16 %v791_v58, %v791_v58 }
 0x163   :  { %947 = vmatmul.bf16.vlgmr.msrb.gmra.mxu1 %v793_v59 }
 0x164   :  { %v788_v60 = vpop.f32.mrf.mxu3 }
 0x1d0   :  { %v935_v2 = vpop.f32.mrf.mxu0 }
 0x1d1   :  { %v936_v5 = vadd.f32 %v1593_v4, %v935_v2 }
 0x1d8   :  { %v937_v3 = vpop.f32.mrf.mxu0 }
 0x1e0   :  { %v948_v6 = vpop.f32.mrf.mxu1 }
 0x1e1   :  { %v949_v7 = vadd.f32 %v948_v6, %v936_v5 }
 0x1e3   :  { %v952_v8 = vmax.f32 %v949_v7, 0.0 }
 0x1e5   :  { %v953_v9 = vpack.c.bf16 %v952_v8, %v952_v8 }
 0x1e7   :  { %1030 = vmatmul.bf16.vlgmr.msrb.gmra.mxu2 %v953_v9 }
 0x1e8   :  { %v950_v10 = vpop.f32.mrf.mxu1 }
 0x26a   :  { %v1031_v12 = vpop.f32.mrf.mxu2 }
 0x26b   :  { %v1032_v13 = vadd.f32 %v1594_v11, %v1031_v12 }
 0x26d   :  { %1035 = vst [vmem:[#allocation13] sm:$0xff] %v1032_v13 }
 0x26e   :  { %1046 = dma.vmem_to_hbm [thread:$0]  %s1042_s23, 128, %s1044_s26, [#allocation4]  }
 0x272   :  { %v1033_v14 = vpop.f32.mrf.mxu2 }
 0x273   :  { %1771 = dma.done.wait [#allocation4], 128  }
 0x274   :  { %1772 = vsyncadd [#allocation4], 4294967168 }
 0x275   :  { %1051 = vsyncpa [#allocation3], 1 }
 0x276   :  { %1052 = vsyncpa [#allocation6], 1 }
 0x277   :  { %1053 = vsyncpa [#allocation9], 1 }
 0x278   :  { %1054 = vsyncpa [#allocation12], 1 }
 0x279   :  { %1055 = vsyncpa [#allocation4], 1 }

</bundles_post_ra>
